<compile_context>
chip_gen: v5e
topology: v5e:2x2
jax: 0.10.0
libtpu: 0.0.40
codegen_flags: <defaults>
</compile_context>

<pallas_src>
import functools

import jax
import jax.numpy as jnp
from jax.experimental import pallas as pl
from jax.experimental.pallas import tpu as pltpu

OC = 256          # out_channels
KSIZE = 9         # kernel_size


def _conv_rowpanel_kernel(p_ref, w_ref, b_ref, o_ref, *, th, wo_pad):
    """One grid step: output rows [r*th, (r+1)*th) x wo_pad cols of image b.

    p_ref : (Hin_pad * wo_pad, 9*C)  width-patch panel of image b (bf16)
    w_ref : (9, 9*C, 256)            weights, indexed [kh, kw*C + c, oc] (bf16)
    b_ref : (1, 256)                 bias (f32)
    o_ref : (th * wo_pad, 256)       output tile (lane-dense 256)
    """
    r = pl.program_id(1)
    tm = th * wo_pad
    base = r * th                                  # first output row of this tile
    acc = jnp.zeros((tm, OC), jnp.float32)
    # Height taps fused in-kernel: 9 row-shifted reads of the VMEM-resident
    # panel, contraction depth 9*C per matmul, f32 accumulation on the MXU.
    for kh in range(KSIZE):
        start = pl.multiple_of((base + kh) * wo_pad, 8)   # sublane-aligned
        lhs = p_ref[pl.ds(start, tm), :]                  # (tm, 9*C) bf16
        acc = acc + jnp.dot(lhs, w_ref[kh], preferred_element_type=jnp.float32)
    acc = acc + b_ref[...]                                # bias broadcast
    o_ref[...] = jnp.maximum(acc, 0.0).astype(o_ref.dtype)


def _choose_th(batch, ho, wo_pad, c, hin_pad_est):
    """Output rows per grid step, sized against a conservative VMEM budget."""
    budget = 32 * 1024 * 1024                                   # working-set target
    panel = hin_pad_est * wo_pad * KSIZE * c * 2 * 2            # panel, bf16, 2 bufs
    wgt = KSIZE * KSIZE * c * OC * 2 * 2                        # weights, bf16, 2 bufs
    fixed = panel + wgt + (2 << 20)                             # + slack (bias, internals)
    per_row = wo_pad * OC * 4 * 2                               # f32 out rows, 2 bufs
    th_vmem = (budget - fixed) // per_row if budget > fixed else 1
    th = int(min(ho, max(1, 512 // wo_pad), max(1, th_vmem)))   # target TM ~ 512 rows
    # v7x has two TensorCores: prefer >= 2 parallel grid steps when possible.
    if batch * (-(-ho // th)) < 2 and th > 1:
        th = -(-ho // 2)
    return max(1, int(th))


@jax.jit
def conv1_forward(x, weight, bias):
    """relu(conv2d(x, weight, bias)), VALID padding, stride 1.

    x: [B, C, H, W] (NCHW); weight: [256, C, 9, 9]; bias: [256].
    Returns [B, 256, H-8, W-8] (NCHW), matching the nn.Module forward.
    """
    B, C, H, W = x.shape
    Ho, Wo = H - KSIZE + 1, W - KSIZE + 1
    out_dtype = x.dtype

    # bf16 cast BEFORE the layout change so the relayout pass moves half the bytes.
    x_nhwc = jnp.transpose(x.astype(jnp.bfloat16), (0, 2, 3, 1))      # [B, H, W, C]

    # Pad Wo to a sublane multiple and Ho to a multiple of TH (junk rows/cols are
    # computed from zero-padded input and sliced off; they never touch valid outputs).
    wo_pad = -(-Wo // 8) * 8
    th = _choose_th(B, Ho, wo_pad, C, Ho + KSIZE - 1 + 8)
    rt = -(-Ho // th)
    ho_pad = rt * th
    hin_pad = ho_pad + KSIZE - 1
    win_pad = wo_pad + KSIZE - 1
    x_p = jnp.pad(x_nhwc, ((0, 0), (0, hin_pad - H), (0, win_pad - W), (0, 0)))

    # Width taps (kw) materialized once, in explicit (kw, c) order — a 9x
    # expansion of x instead of the previous 81x im2col matrix.  Height taps
    # (kh) are fused inside the kernel via row-shifted reads of this panel.
    # TODO(synk): also fuse the width taps (build the 9C windows in a VMEM
    # scratch) to drop this last 9x stream; needs lane-offset scatter per tap.
    panel = jnp.concatenate(
        [x_p[:, :, kw:kw + wo_pad, :] for kw in range(KSIZE)], axis=3)
    panel = panel.reshape(B, hin_pad * wo_pad, KSIZE * C)             # [B, rows, 9C]

    # Weights in [kh, kw*C + c, oc] order to match the panel's feature order.
    # (In a real model these casts/transposes would be precomputed once.)
    w_k = jnp.transpose(weight, (2, 3, 1, 0)).reshape(KSIZE, KSIZE * C, OC)
    w_k = w_k.astype(jnp.bfloat16)
    b2 = bias.reshape(1, OC).astype(jnp.float32)

    tm = th * wo_pad
    m_total = B * ho_pad * wo_pad
    flops = 2 * m_total * (KSIZE * KSIZE * C) * OC
    bytes_accessed = (panel.size * 2 + w_k.size * 2 + b2.size * 4
                      + m_total * OC * jnp.dtype(out_dtype).itemsize)

    out = pl.pallas_call(
        functools.partial(_conv_rowpanel_kernel, th=th, wo_pad=wo_pad),
        out_shape=jax.ShapeDtypeStruct((B, ho_pad * wo_pad, OC), out_dtype),
        grid_spec=pltpu.PrefetchScalarGridSpec(
            num_scalar_prefetch=0,
            grid=(B, rt),
            in_specs=[
                # Whole width-patch panel of image b stays resident in VMEM
                # across its row tiles (constant index along r => one DMA per b,
                # prefetched for b+1 while b is computing).
                pl.BlockSpec((None, hin_pad * wo_pad, KSIZE * C),
                             lambda b, r: (b, 0, 0)),
                pl.BlockSpec((KSIZE, KSIZE * C, OC), lambda b, r: (0, 0, 0)),
                pl.BlockSpec((1, OC), lambda b, r: (0, 0)),
            ],
            out_specs=pl.BlockSpec((None, tm, OC), lambda b, r: (b, r, 0)),
        ),
        compiler_params=pltpu.CompilerParams(
            dimension_semantics=("parallel", "parallel"),
            vmem_limit_bytes=48 * 1024 * 1024,
        ),
        cost_estimate=pl.CostEstimate(
            flops=flops, transcendentals=0, bytes_accessed=bytes_accessed),
    )(panel, w_k, b2)

    out = out.reshape(B, ho_pad, wo_pad, OC)[:, :Ho, :Wo, :]
    # The module contract is NCHW; one relayout pass back.
    # TODO(synk): if the surrounding model can consume NHWC (and/or bf16),
    # return `out` directly and drop this transpose (full extra HBM pass).
    return jnp.transpose(out, (0, 3, 1, 2))


if __name__ == "__main__":
    # Small deterministic example consistent with the module:
    # batch=2, channels=4, spatial=16 -> output spatial 8x8.
    B, C, H, W = 2, 4, 16, 16
    key = jax.random.PRNGKey(0)
    k_x, k_w, k_b = jax.random.split(key, 3)

    x = jax.random.normal(k_x, (B, C, H, W), dtype=jnp.float32)
    fan_in = C * KSIZE * KSIZE
    weight = jax.random.normal(k_w, (OC, C, KSIZE, KSIZE), dtype=jnp.float32) * (1.0 / fan_in) ** 0.5
    bias = jax.random.normal(k_b, (OC,), dtype=jnp.float32) * 0.01

    out = conv1_forward(x, weight, bias)
    out = jax.block_until_ready(out)

    # Reference: XLA conv + bias + ReLU with operands pre-rounded to bf16 (the
    # kernel feeds the MXU bf16 operands with f32 accumulation).
    x_bf = x.astype(jnp.bfloat16).astype(jnp.float32)
    w_bf = weight.astype(jnp.bfloat16).astype(jnp.float32)
    ref = jax.lax.conv_general_dilated(
        x_bf, w_bf, window_strides=(1, 1), padding="VALID",
        dimension_numbers=("NCHW", "OIHW", "NCHW"),
        precision=jax.lax.Precision.HIGHEST)
    ref = jnp.maximum(ref + bias.reshape(1, OC, 1, 1), 0.0)

    assert out.shape == (B, OC, H - KSIZE + 1, W - KSIZE + 1)
    err = float(jnp.max(jnp.abs(out - ref)))
    assert jnp.allclose(out, ref, atol=2e-2, rtol=2e-2), err

    print("KERNEL_OK")
</pallas_src>

<mosaic_0001>
module attributes {stable_mosaic.version = 11 : i64} {
  func.func @_conv_rowpanel_kernel(%arg0: i32, %arg1: i32, %arg2: memref<1x128x36xbf16, #tpu.memory_space<vmem>>, %arg3: memref<9x36x256xbf16, #tpu.memory_space<vmem>>, %arg4: memref<1x256xf32, #tpu.memory_space<vmem>>, %arg5: memref<1x64x256xf32, #tpu.memory_space<vmem>>) attributes {dimension_semantics = [#tpu.dimension_semantics<parallel>, #tpu.dimension_semantics<parallel>], iteration_bounds = array<i64: 2, 1>, scalar_prefetch = 0 : i64, scratch_operands = 0 : i64, tpu.core_type = #tpu.core_type<tc>, window_params = [{transform_indices = @transform_0, window_bounds = array<i64: 1, 128, 36>}, {pipeline_mode = #tpu.pipeline_mode<synchronous>, transform_indices = @transform_1, window_bounds = array<i64: 9, 36, 256>}, {pipeline_mode = #tpu.pipeline_mode<synchronous>, transform_indices = @transform_2, window_bounds = array<i64: 1, 256>}, {transform_indices = @transform_3, window_bounds = array<i64: 1, 64, 256>}]} {
    %c8_i32 = arith.constant 8 : i32
    %0 = arith.muli %arg1, %c8_i32 : i32
    %cst = arith.constant 0.000000e+00 : f32
    %1 = vector.broadcast %cst : f32 to vector<64x256xf32>
    %c0_i32 = arith.constant 0 : i32
    %2 = arith.addi %0, %c0_i32 : i32
    %c8_i32_0 = arith.constant 8 : i32
    %3 = arith.muli %2, %c8_i32_0 : i32
    %4 = tpu.assume_multiple %3, 8 : i32
    %c0 = arith.constant 0 : index
    %5 = arith.index_cast %4 : i32 to index
    %c0_1 = arith.constant 0 : index
    %6 = vector.load %arg2[%c0, %5, %c0_1] : memref<1x128x36xbf16, #tpu.memory_space<vmem>>, vector<1x64x36xbf16>
    %7 = vector.shape_cast %6 : vector<1x64x36xbf16> to vector<64x36xbf16>
    %c0_2 = arith.constant 0 : index
    %c0_3 = arith.constant 0 : index
    %c0_4 = arith.constant 0 : index
    %8 = vector.load %arg3[%c0_2, %c0_3, %c0_4] : memref<9x36x256xbf16, #tpu.memory_space<vmem>>, vector<1x36x256xbf16>
    %9 = vector.shape_cast %8 : vector<1x36x256xbf16> to vector<36x256xbf16>
    %cst_5 = arith.constant dense<0.000000e+00> : vector<64x256xf32>
    %10 = tpu.matmul %7, %9, %cst_5 {dimension_numbers = #tpu.dot_dimension_numbers<[1], [0], [0], [1], [0, 0, 1, 1], [], []>} : vector<64x36xbf16>, vector<36x256xbf16>, vector<64x256xf32> -> vector<64x256xf32>
    %11 = arith.addf %1, %10 : vector<64x256xf32>
    %c1_i32 = arith.constant 1 : i32
    %12 = arith.addi %0, %c1_i32 : i32
    %c8_i32_6 = arith.constant 8 : i32
    %13 = arith.muli %12, %c8_i32_6 : i32
    %14 = tpu.assume_multiple %13, 8 : i32
    %c0_7 = arith.constant 0 : index
    %15 = arith.index_cast %14 : i32 to index
    %c0_8 = arith.constant 0 : index
    %16 = vector.load %arg2[%c0_7, %15, %c0_8] : memref<1x128x36xbf16, #tpu.memory_space<vmem>>, vector<1x64x36xbf16>
    %17 = vector.shape_cast %16 : vector<1x64x36xbf16> to vector<64x36xbf16>
    %c1 = arith.constant 1 : index
    %c0_9 = arith.constant 0 : index
    %c0_10 = arith.constant 0 : index
    %18 = vector.load %arg3[%c1, %c0_9, %c0_10] : memref<9x36x256xbf16, #tpu.memory_space<vmem>>, vector<1x36x256xbf16>
    %19 = vector.shape_cast %18 : vector<1x36x256xbf16> to vector<36x256xbf16>
    %cst_11 = arith.constant dense<0.000000e+00> : vector<64x256xf32>
    %20 = tpu.matmul %17, %19, %cst_11 {dimension_numbers = #tpu.dot_dimension_numbers<[1], [0], [0], [1], [0, 0, 1, 1], [], []>} : vector<64x36xbf16>, vector<36x256xbf16>, vector<64x256xf32> -> vector<64x256xf32>
    %21 = arith.addf %11, %20 : vector<64x256xf32>
    %c2_i32 = arith.constant 2 : i32
    %22 = arith.addi %0, %c2_i32 : i32
    %c8_i32_12 = arith.constant 8 : i32
    %23 = arith.muli %22, %c8_i32_12 : i32
    %24 = tpu.assume_multiple %23, 8 : i32
    %c0_13 = arith.constant 0 : index
    %25 = arith.index_cast %24 : i32 to index
    %c0_14 = arith.constant 0 : index
    %26 = vector.load %arg2[%c0_13, %25, %c0_14] : memref<1x128x36xbf16, #tpu.memory_space<vmem>>, vector<1x64x36xbf16>
    %27 = vector.shape_cast %26 : vector<1x64x36xbf16> to vector<64x36xbf16>
    %c2 = arith.constant 2 : index
    %c0_15 = arith.constant 0 : index
    %c0_16 = arith.constant 0 : index
    %28 = vector.load %arg3[%c2, %c0_15, %c0_16] : memref<9x36x256xbf16, #tpu.memory_space<vmem>>, vector<1x36x256xbf16>
    %29 = vector.shape_cast %28 : vector<1x36x256xbf16> to vector<36x256xbf16>
    %cst_17 = arith.constant dense<0.000000e+00> : vector<64x256xf32>
    %30 = tpu.matmul %27, %29, %cst_17 {dimension_numbers = #tpu.dot_dimension_numbers<[1], [0], [0], [1], [0, 0, 1, 1], [], []>} : vector<64x36xbf16>, vector<36x256xbf16>, vector<64x256xf32> -> vector<64x256xf32>
    %31 = arith.addf %21, %30 : vector<64x256xf32>
    %c3_i32 = arith.constant 3 : i32
    %32 = arith.addi %0, %c3_i32 : i32
    %c8_i32_18 = arith.constant 8 : i32
    %33 = arith.muli %32, %c8_i32_18 : i32
    %34 = tpu.assume_multiple %33, 8 : i32
    %c0_19 = arith.constant 0 : index
    %35 = arith.index_cast %34 : i32 to index
    %c0_20 = arith.constant 0 : index
    %36 = vector.load %arg2[%c0_19, %35, %c0_20] : memref<1x128x36xbf16, #tpu.memory_space<vmem>>, vector<1x64x36xbf16>
    %37 = vector.shape_cast %36 : vector<1x64x36xbf16> to vector<64x36xbf16>
    %c3 = arith.constant 3 : index
    %c0_21 = arith.constant 0 : index
    %c0_22 = arith.constant 0 : index
    %38 = vector.load %arg3[%c3, %c0_21, %c0_22] : memref<9x36x256xbf16, #tpu.memory_space<vmem>>, vector<1x36x256xbf16>
    %39 = vector.shape_cast %38 : vector<1x36x256xbf16> to vector<36x256xbf16>
    %cst_23 = arith.constant dense<0.000000e+00> : vector<64x256xf32>
    %40 = tpu.matmul %37, %39, %cst_23 {dimension_numbers = #tpu.dot_dimension_numbers<[1], [0], [0], [1], [0, 0, 1, 1], [], []>} : vector<64x36xbf16>, vector<36x256xbf16>, vector<64x256xf32> -> vector<64x256xf32>
    %41 = arith.addf %31, %40 : vector<64x256xf32>
    %c4_i32 = arith.constant 4 : i32
    %42 = arith.addi %0, %c4_i32 : i32
    %c8_i32_24 = arith.constant 8 : i32
    %43 = arith.muli %42, %c8_i32_24 : i32
    %44 = tpu.assume_multiple %43, 8 : i32
    %c0_25 = arith.constant 0 : index
    %45 = arith.index_cast %44 : i32 to index
    %c0_26 = arith.constant 0 : index
    %46 = vector.load %arg2[%c0_25, %45, %c0_26] : memref<1x128x36xbf16, #tpu.memory_space<vmem>>, vector<1x64x36xbf16>
    %47 = vector.shape_cast %46 : vector<1x64x36xbf16> to vector<64x36xbf16>
    %c4 = arith.constant 4 : index
    %c0_27 = arith.constant 0 : index
    %c0_28 = arith.constant 0 : index
    %48 = vector.load %arg3[%c4, %c0_27, %c0_28] : memref<9x36x256xbf16, #tpu.memory_space<vmem>>, vector<1x36x256xbf16>
    %49 = vector.shape_cast %48 : vector<1x36x256xbf16> to vector<36x256xbf16>
    %cst_29 = arith.constant dense<0.000000e+00> : vector<64x256xf32>
    %50 = tpu.matmul %47, %49, %cst_29 {dimension_numbers = #tpu.dot_dimension_numbers<[1], [0], [0], [1], [0, 0, 1, 1], [], []>} : vector<64x36xbf16>, vector<36x256xbf16>, vector<64x256xf32> -> vector<64x256xf32>
    %51 = arith.addf %41, %50 : vector<64x256xf32>
    %c5_i32 = arith.constant 5 : i32
    %52 = arith.addi %0, %c5_i32 : i32
    %c8_i32_30 = arith.constant 8 : i32
    %53 = arith.muli %52, %c8_i32_30 : i32
    %54 = tpu.assume_multiple %53, 8 : i32
    %c0_31 = arith.constant 0 : index
    %55 = arith.index_cast %54 : i32 to index
    %c0_32 = arith.constant 0 : index
    %56 = vector.load %arg2[%c0_31, %55, %c0_32] : memref<1x128x36xbf16, #tpu.memory_space<vmem>>, vector<1x64x36xbf16>
    %57 = vector.shape_cast %56 : vector<1x64x36xbf16> to vector<64x36xbf16>
    %c5 = arith.constant 5 : index
    %c0_33 = arith.constant 0 : index
    %c0_34 = arith.constant 0 : index
    %58 = vector.load %arg3[%c5, %c0_33, %c0_34] : memref<9x36x256xbf16, #tpu.memory_space<vmem>>, vector<1x36x256xbf16>
    %59 = vector.shape_cast %58 : vector<1x36x256xbf16> to vector<36x256xbf16>
    %cst_35 = arith.constant dense<0.000000e+00> : vector<64x256xf32>
    %60 = tpu.matmul %57, %59, %cst_35 {dimension_numbers = #tpu.dot_dimension_numbers<[1], [0], [0], [1], [0, 0, 1, 1], [], []>} : vector<64x36xbf16>, vector<36x256xbf16>, vector<64x256xf32> -> vector<64x256xf32>
    %61 = arith.addf %51, %60 : vector<64x256xf32>
    %c6_i32 = arith.constant 6 : i32
    %62 = arith.addi %0, %c6_i32 : i32
    %c8_i32_36 = arith.constant 8 : i32
    %63 = arith.muli %62, %c8_i32_36 : i32
    %64 = tpu.assume_multiple %63, 8 : i32
    %c0_37 = arith.constant 0 : index
    %65 = arith.index_cast %64 : i32 to index
    %c0_38 = arith.constant 0 : index
    %66 = vector.load %arg2[%c0_37, %65, %c0_38] : memref<1x128x36xbf16, #tpu.memory_space<vmem>>, vector<1x64x36xbf16>
    %67 = vector.shape_cast %66 : vector<1x64x36xbf16> to vector<64x36xbf16>
    %c6 = arith.constant 6 : index
    %c0_39 = arith.constant 0 : index
    %c0_40 = arith.constant 0 : index
    %68 = vector.load %arg3[%c6, %c0_39, %c0_40] : memref<9x36x256xbf16, #tpu.memory_space<vmem>>, vector<1x36x256xbf16>
    %69 = vector.shape_cast %68 : vector<1x36x256xbf16> to vector<36x256xbf16>
    %cst_41 = arith.constant dense<0.000000e+00> : vector<64x256xf32>
    %70 = tpu.matmul %67, %69, %cst_41 {dimension_numbers = #tpu.dot_dimension_numbers<[1], [0], [0], [1], [0, 0, 1, 1], [], []>} : vector<64x36xbf16>, vector<36x256xbf16>, vector<64x256xf32> -> vector<64x256xf32>
    %71 = arith.addf %61, %70 : vector<64x256xf32>
    %c7_i32 = arith.constant 7 : i32
    %72 = arith.addi %0, %c7_i32 : i32
    %c8_i32_42 = arith.constant 8 : i32
    %73 = arith.muli %72, %c8_i32_42 : i32
    %74 = tpu.assume_multiple %73, 8 : i32
    %c0_43 = arith.constant 0 : index
    %75 = arith.index_cast %74 : i32 to index
    %c0_44 = arith.constant 0 : index
    %76 = vector.load %arg2[%c0_43, %75, %c0_44] : memref<1x128x36xbf16, #tpu.memory_space<vmem>>, vector<1x64x36xbf16>
    %77 = vector.shape_cast %76 : vector<1x64x36xbf16> to vector<64x36xbf16>
    %c7 = arith.constant 7 : index
    %c0_45 = arith.constant 0 : index
    %c0_46 = arith.constant 0 : index
    %78 = vector.load %arg3[%c7, %c0_45, %c0_46] : memref<9x36x256xbf16, #tpu.memory_space<vmem>>, vector<1x36x256xbf16>
    %79 = vector.shape_cast %78 : vector<1x36x256xbf16> to vector<36x256xbf16>
    %cst_47 = arith.constant dense<0.000000e+00> : vector<64x256xf32>
    %80 = tpu.matmul %77, %79, %cst_47 {dimension_numbers = #tpu.dot_dimension_numbers<[1], [0], [0], [1], [0, 0, 1, 1], [], []>} : vector<64x36xbf16>, vector<36x256xbf16>, vector<64x256xf32> -> vector<64x256xf32>
    %81 = arith.addf %71, %80 : vector<64x256xf32>
    %c8_i32_48 = arith.constant 8 : i32
    %82 = arith.addi %0, %c8_i32_48 : i32
    %c8_i32_49 = arith.constant 8 : i32
    %83 = arith.muli %82, %c8_i32_49 : i32
    %84 = tpu.assume_multiple %83, 8 : i32
    %c0_50 = arith.constant 0 : index
    %85 = arith.index_cast %84 : i32 to index
    %c0_51 = arith.constant 0 : index
    %86 = vector.load %arg2[%c0_50, %85, %c0_51] : memref<1x128x36xbf16, #tpu.memory_space<vmem>>, vector<1x64x36xbf16>
    %87 = vector.shape_cast %86 : vector<1x64x36xbf16> to vector<64x36xbf16>
    %c8 = arith.constant 8 : index
    %c0_52 = arith.constant 0 : index
    %c0_53 = arith.constant 0 : index
    %88 = vector.load %arg3[%c8, %c0_52, %c0_53] : memref<9x36x256xbf16, #tpu.memory_space<vmem>>, vector<1x36x256xbf16>
    %89 = vector.shape_cast %88 : vector<1x36x256xbf16> to vector<36x256xbf16>
    %cst_54 = arith.constant dense<0.000000e+00> : vector<64x256xf32>
    %90 = tpu.matmul %87, %89, %cst_54 {dimension_numbers = #tpu.dot_dimension_numbers<[1], [0], [0], [1], [0, 0, 1, 1], [], []>} : vector<64x36xbf16>, vector<36x256xbf16>, vector<64x256xf32> -> vector<64x256xf32>
    %91 = arith.addf %81, %90 : vector<64x256xf32>
    %c0_55 = arith.constant 0 : index
    %c0_56 = arith.constant 0 : index
    %92 = vector.load %arg4[%c0_55, %c0_56] : memref<1x256xf32, #tpu.memory_space<vmem>>, vector<1x256xf32>
    %93 = vector.broadcast %92 : vector<1x256xf32> to vector<64x256xf32>
    %94 = arith.addf %91, %93 : vector<64x256xf32>
    %cst_57 = arith.constant 0.000000e+00 : f32
    %95 = vector.broadcast %cst_57 : f32 to vector<64x256xf32>
    %96 = arith.maximumf %94, %95 : vector<64x256xf32>
    %c0_58 = arith.constant 0 : index
    %c0_59 = arith.constant 0 : index
    %c0_60 = arith.constant 0 : index
    %97 = vector.load %arg5[%c0_58, %c0_59, %c0_60] : memref<1x64x256xf32, #tpu.memory_space<vmem>>, vector<1x64x256xf32>
    %98 = vector.shape_cast %97 : vector<1x64x256xf32> to vector<64x256xf32>
    %99 = vector.shape_cast %96 : vector<64x256xf32> to vector<1x64x256xf32>
    tpu.vector_store %arg5[%c0_58, %c0_59, %c0_60], %99 {strides = array<i32>} : memref<1x64x256xf32, #tpu.memory_space<vmem>>, vector<1x64x256xf32>,
    return
  }
  func.func @transform_0(%arg0: i32, %arg1: i32) -> (i32, i32, i32) {
    %c0_i32 = arith.constant 0 : i32
    %c0_i32_0 = arith.constant 0 : i32
    %c0_i32_1 = arith.constant 0 : i32
    return %arg0, %c0_i32, %c0_i32_0 : i32, i32, i32
  }
  func.func @transform_1(%arg0: i32, %arg1: i32) -> (i32, i32, i32) {
    %c0_i32 = arith.constant 0 : i32
    %c0_i32_0 = arith.constant 0 : i32
    %c0_i32_1 = arith.constant 0 : i32
    %c0_i32_2 = arith.constant 0 : i32
    return %c0_i32, %c0_i32_0, %c0_i32_1 : i32, i32, i32
  }
  func.func @transform_2(%arg0: i32, %arg1: i32) -> (i32, i32) {
    %c0_i32 = arith.constant 0 : i32
    %c0_i32_0 = arith.constant 0 : i32
    %c0_i32_1 = arith.constant 0 : i32
    return %c0_i32, %c0_i32_0 : i32, i32
  }
  func.func @transform_3(%arg0: i32, %arg1: i32) -> (i32, i32, i32) {
    %c0_i32 = arith.constant 0 : i32
    %c0_i32_0 = arith.constant 0 : i32
    return %arg0, %arg1, %c0_i32 : i32, i32, i32
  }
}

</mosaic_0001>

<bundles_post_ra>
// kernel: conv1_forward.1
= control target key start
LH: loop header
LB: loop body
LE: loop exit
PB: predicated region body
PF: predicated region fallthrough
CT: control target
= control target key end

     0   :  { %8 = vsyncpa [#allocation3], 0  ;;  %s3171_s0 = inlined_call_operand.vmem [shape: bf16[2,128,36], index: 0, kind: input, shape index: {}]   ;;  %s3172_s1 = inlined_call_operand.vmem [shape: bf16[9,36,256], index: 1, kind: input, shape index: {}]   ;;  %s3173_s2 = inlined_call_operand.vmem [shape: f32[1,256], index: 2, kind: input, shape index: {}]   ;;  %s3174_s3 = inlined_call_operand.hbm [shape: f32[2,64,256], index: 3, kind: output, shape index: {}]  }
   0x1   :  { %10 = vsyncpa [#allocation3 + $0x1], 0  ;;  %s2447_s12 = smov 0   ;;  %s2449_s13 = smov 0  }
   0x2   :  { %s2451_s14 = smov 0   ;;  %s2453_s15 = smov 0  }
   0x3   :  { %s2455_s16 = smov 0   ;;  %s2457_s17 = smov 0  }
   0x4 LB: > { %s1731_s18 = sadd.s32 4294967295, %s2423_s17   ;;  %s1732_s19 = sadd.s32 4294967294, %s2423_s17   ;;  %s2423_s17 = sphi %s2457_s17, %s16_s17   ;;  %s2419_s16 = sphi %s2455_s16, %s3181_s16   ;;  %s2415_s15 = sphi %s2453_s15, %s3180_s15   ;;  %s2411_s14 = sphi %s2451_s14, %s3179_s14   ;;  %s2407_s13 = sphi %s2449_s13, %s3178_s13   ;;  %s2403_s12 = sphi %s2447_s12, %s3177_s12  }
   0x5   : > { %s28_s20 = sadd.s32 1, %s2419_s16  ;;  %s105_s21 = sadd.s32 1, %s2411_s14 }
   0x6   : > { %p30_p0 = scmp.ge.s32.totalorder %s28_s20, 2  ;;  %p115_p1 = scmp.ne.s32.totalorder %s2411_s14, %s2407_s13 }
   0x7   : > { %p116_p2 = scmp.eq.s32.totalorder %s1731_s18, 1  ;;  %p121_p3 = scmp.ne.s32.totalorder %s2407_s13, %s2403_s12 }
   0x8   : > { %s3183_s20 = smov (%p30_p0, %s28_s20), 0  ;;  %p122_p5 = scmp.eq.s32.totalorder %s1732_s19, 1 }
   0x9   : > { %p2487_p4 = por %p116_p2, %p115_p1  ;;  %s100_s23 = ssub.s32 %s2419_s16, %s3183_s20 }
   0xa   : > { %p1735_p6 = scmp.ge.s32.totalorder %s2423_s17, 1  ;;  %p103_p7 = scmp.eq.s32.totalorder %s100_s23, 0 }
   0xb   : > { %p2494_p8 = por %p122_p5, %p121_p3  ;;  %p154_p9 = scmp.lt.s32.totalorder %s2423_s17, 3 }
   0xc   : > { %s2500_s25 = scalar_select %p103_p7, %s2411_s14, %s105_s21  }
   0xd   : > { %p155_p10 = pnand %p1735_p6, %p154_p9 }
   0xe   : > { %p178_p11 = scmp.lt.s32.totalorder (!%p155_p10), %s2415_s15, 1  ;;  %s175_s6 = sand.u32 (!%p155_p10), 1, %s2407_s13  }
   0xf   : > { %158 = sbr.rel (%p155_p10) target bundleno = 464 (0x1d0), region = 32  ;;  %s1736_s7 = sshll.u32 (!%p155_p10), %s175_s6, 7 }
  0x10   : > { %s3066_s8 = scalar_lea.vmem (!%p155_p10), [#allocation2], %s1736_s7  ;;  %s1622_s21 = scalar_lea.sflag (!%p155_p10), [#allocation3], %s175_s6 }
  0x11   : > { %s2365_s29 = scalar_lea.hbm (!%p155_p10), %s3174_s3, 256 }
  0x14   : > { %v1751_v0 = vld [vmem:[%s3172_s1 + $0x48] sm:$0x33]  ;;  %vm282_vm0 = vcmask 1041408   ;;  %v1778_v3 = vld [vmem:[%s3172_s1 + $0x38] sm:$0xf]  ;;  %s179_s5 = scalar_select %p178_p11, %s2415_s15, 1 }
  0x15   : > { %v257_v1 = vunpack.c.l.b16 %v1751_v0  ;;  %v258_v2 = vunpack.c.h.b16 %v1751_v0  ;;  %v2224_v6 = vld [vmem:[%s3172_s1 + $0x3c] sm:$0xf0]  ;;  %v2223_v8 = vld [vmem:[%s3172_s1 + $0x3c] sm:$0xf]  ;;  %v1780_v9 = vld [vmem:[%s3172_s1 + $0x40] sm:$0xf0] }
  0x16   : > { %v203_v7 = vld [vmem:[%s3172_s1 + $0x20] sm:$0x33]  ;;  %v1844_v14 = vld [vmem:[%s3172_s1 + $0x70] sm:$0x33]  ;;  %v1779_v15 = vor.u32 %v2224_v6, %v1778_v3  ;;  %v1783_v16 = vor.u32 %v2223_v8, %v1780_v9  ;;  %v1770_v17 = vld [vmem:[%s3172_s1 + $0x28] sm:$0xf] }
  0x17   : > { %v263_v4 = vpack.c.b16 %v257_v1, %v257_v1  ;;  %v264_v5 = vpack.c.b16 %v258_v2, %v258_v2  ;;  %v380_v12 = vunpack.c.l.b16 %v203_v7  ;;  %v381_v13 = vunpack.c.h.b16 %v203_v7  ;;  %v2222_v18 = vld [vmem:[%s3172_s1 + $0x2c] sm:$0xf0]  ;;  %s2208_s28 = sshll.u32 %s179_s5, 6  ;;  %v2221_v19 = vld [vmem:[%s3172_s1 + $0x2c] sm:$0xf]  ;;  %s2281_s5 = sshll.u32 %s2415_s15, 7 }
  0x18   : > { %v1772_v20 = vld [vmem:[%s3172_s1 + $0x30] sm:$0xf0]  ;;  %v521_v21 = vunpack.c.l.b16 %v1844_v14  ;;  %v522_v22 = vunpack.c.h.b16 %v1844_v14  ;;  %v1771_v25 = vor.u32 %v2222_v18, %v1770_v17  ;;  %s2542_s9 = scalar_lea.vmem %s3171_s0, %s2208_s28  ;;  %v1818_v29 = vld [vmem:[%s3172_s1 + $0x10] sm:$0xf]  ;;  %v2216_v30 = vld [vmem:[%s3172_s1 + $0x14] sm:$0xf0]  ;;  %s1636_s18 = scalar_lea.hbm %s3174_s3, %s2281_s5 }
  0x19   : > { %v284_v10 = vsel %vm282_vm0, %v263_v4, 0  ;;  %v287_v11 = vsel %vm282_vm0, %v264_v5, 0  ;;  %v386_v23 = vpack.c.b16 %v380_v12, %v380_v12  ;;  %v387_v24 = vpack.c.b16 %v381_v13, %v381_v13  ;;  %v2215_v31 = vld [vmem:[%s3172_s1 + $0x14] sm:$0xf]  ;;  %v2217_v32 = vld [vmem:[%s2542_s9 + $0x4] sm:$0xff]  ;;  %v2218_v9 = vld [vmem:[%s2542_s9 + $0xc] sm:$0xff] }
  0x1a   : > { %294 = vmatpush.bf16.msra.mxu0 %v284_v10  ;;  %2282 = vmatpush.bf16.msra.mxu2 %v284_v10  ;;  %v1775_v26 = vor.u32 %v2221_v19, %v1772_v20  ;;  %v527_v27 = vpack.c.b16 %v521_v21, %v521_v21  ;;  %v528_v28 = vpack.c.b16 %v522_v22, %v522_v22  ;;  %v2219_v33 = vld [vmem:[%s2542_s9 + $0x14] sm:$0xff]  ;;  %v1820_v36 = vld [vmem:[%s3172_s1 + $0x18] sm:$0xf0]  ;;  %vm269_vm1 = vcmask 293888   ;;  %v1871_v37 = vld [vmem:[%s3172_s1 + $0x60] sm:$0xf] }
  0x1b   : > { %323 = vmatpush.bf16.msra.mxu1 %v287_v11  ;;  %2285 = vmatpush.bf16.msra.mxu3 %v287_v11  ;;  %v405_v34 = vsel %vm282_vm0, %v386_v23, 0  ;;  %v408_v35 = vsel %vm282_vm0, %v387_v24, 0  ;;  %v2232_v38 = vld [vmem:[%s3172_s1 + $0x64] sm:$0xf0]  ;;  %v2231_v39 = vld [vmem:[%s3172_s1 + $0x64] sm:$0xf]  ;;  %v1819_v43 = vor.u32 %v2216_v30, %v1818_v29  ;;  %v1823_v44 = vor.u32 %v2215_v31, %v1820_v36 }
  0x1c   : > { %v1873_v40 = vld [vmem:[%s3172_s1 + $0x68] sm:$0xf0]  ;;  %v546_v41 = vsel %vm282_vm0, %v527_v27, 0  ;;  %v549_v42 = vsel %vm282_vm0, %v528_v28, 0  ;;  %v1810_v45 = vld [vmem:[%s3172_s1] sm:$0xf]  ;;  %v1872_v49 = vor.u32 %v2232_v38, %v1871_v37 }
  0x1d   : > { %v2214_v46 = vld [vmem:[%s3172_s1 + $0x4] sm:$0xf0]  ;;  %v2213_v47 = vld [vmem:[%s3172_s1 + $0x4] sm:$0xf]  ;;  %v1812_v48 = vld [vmem:[%s3172_s1 + $0x8] sm:$0xf0]  ;;  %v1876_v50 = vor.u32 %v2231_v39, %v1873_v40 }
  0x1e   : > { %295 = vmatpush.bf16.msra.mxu0 %v1779_v15  ;;  %2283 = vmatpush.bf16.msra.mxu2 %v1779_v15  ;;  %v1897_v51 = vld [vmem:[%s3172_s1 + $0x98] sm:$0x33]  ;;  %v1950_v52 = vld [vmem:[%s3172_s1 + $0xc0] sm:$0x33]  ;;  %v1863_v53 = vld [vmem:[%s3172_s1 + $0x50] sm:$0xf]  ;;  %v1811_v58 = vor.u32 %v2214_v46, %v1810_v45  ;;  %v1815_v59 = vor.u32 %v2213_v47, %v1812_v48 }
  0x1f   : > { %324 = vmatpush.bf16.msra.mxu1 %v1783_v16  ;;  %2286 = vmatpush.bf16.msra.mxu3 %v1783_v16  ;;  %v678_v54 = vunpack.c.l.b16 %v1897_v51  ;;  %v679_v55 = vunpack.c.h.b16 %v1897_v51  ;;  %v835_v56 = vunpack.c.l.b16 %v1950_v52  ;;  %v836_v57 = vunpack.c.h.b16 %v1950_v52  ;;  %v2230_v60 = vld [vmem:[%s3172_s1 + $0x54] sm:$0xf0]  ;;  %v2229_v61 = vld [vmem:[%s3172_s1 + $0x54] sm:$0xf]  ;;  %v1865_v62 = vld [vmem:[%s3172_s1 + $0x58] sm:$0xf0] }
  0x20   : > { %v1864_v3 = vor.u32 %v2230_v60, %v1863_v53  ;;  %v1868_v4 = vor.u32 %v2229_v61, %v1865_v62  ;;  %v2220_v10 = vld [vmem:[%s2542_s9 + $0x1c] sm:$0xff]  ;;  %v1924_v11 = vld [vmem:[%s3172_s1 + $0x88] sm:$0xf]  ;;  %v2240_v12 = vld [vmem:[%s3172_s1 + $0x8c] sm:$0xf0]  ;;  %s1637_s15 = sshll.u32 %s3066_s8, 4  ;;  %s1638_s15 = int_to_ptr.vmem [resolvable:$true] %s1637_s15 }
  0x21   : > { %v684_v63 = vpack.c.b16 %v678_v54, %v678_v54  ;;  %v685_v0 = vpack.c.b16 %v679_v55, %v679_v55  ;;  %v841_v1 = vpack.c.b16 %v835_v56, %v835_v56  ;;  %v842_v2 = vpack.c.b16 %v836_v57, %v836_v57  ;;  %v2239_v13 = vld [vmem:[%s3172_s1 + $0x8c] sm:$0xf]  ;;  %v1926_v15 = vld [vmem:[%s3172_s1 + $0x90] sm:$0xf0]  ;;  %v1977_v16 = vld [vmem:[%s3172_s1 + $0xb0] sm:$0xf] }
  0x22   : > { %296 = vmatpush.bf16.msra.mxu0 %v1771_v25  ;;  %2284 = vmatpush.bf16.msra.mxu2 %v1771_v25  ;;  %v1925_v14 = vor.u32 %v2240_v12, %v1924_v11  ;;  %v2248_v17 = vld [vmem:[%s3172_s1 + $0xb4] sm:$0xf0]  ;;  %v1929_v18 = vor.u32 %v2239_v13, %v1926_v15  ;;  %v2247_v20 = vld [vmem:[%s3172_s1 + $0xb4] sm:$0xf]  ;;  %v1979_v21 = vld [vmem:[%s3172_s1 + $0xb8] sm:$0xf0] }
  0x23   : > { %325 = vmatpush.bf16.msra.mxu1 %v1775_v26  ;;  %2287 = vmatpush.bf16.msra.mxu3 %v1775_v26  ;;  %v703_v5 = vsel %vm282_vm0, %v684_v63, 0  ;;  %v706_v6 = vsel %vm282_vm0, %v685_v0, 0  ;;  %v860_v7 = vsel %vm282_vm0, %v841_v1, 0  ;;  %v863_v8 = vsel %vm282_vm0, %v842_v2, 0  ;;  %v2209_v23 = vld [vmem:[%s2542_s9] sm:$0xff]  ;;  %v2225_v24 = vld [vmem:[%s2542_s9 + $0x8] sm:$0xff] }
  0x24   : > { %v1978_v19 = vor.u32 %v2248_v17, %v1977_v16  ;;  %v1982_v22 = vor.u32 %v2247_v20, %v1979_v21  ;;  %v1916_v25 = vld [vmem:[%s3172_s1 + $0x78] sm:$0xf]  ;;  %v2238_v26 = vld [vmem:[%s3172_s1 + $0x7c] sm:$0xf0]  ;;  %v2237_v27 = vld [vmem:[%s3172_s1 + $0x7c] sm:$0xf] }
  0x25   : > { %1784 = vmatmul.msk.bf16.vlgmr.msra.gmra.mxu0 %vm269_vm1, %v2217_v32  ;;  %1786 = vmatmul.msk.bf16.vlgmr.msra.gmra.mxu2 %vm269_vm1, %v2219_v33  ;;  %v1917_v28 = vor.u32 %v2238_v26, %v1916_v25  ;;  %v1918_v29 = vld [vmem:[%s3172_s1 + $0x80] sm:$0xf0]  ;;  %v2210_v31 = vld [vmem:[%s2542_s9 + $0x8] sm:$0xff]  ;;  %v2211_v39 = vld [vmem:[%s2542_s9 + $0x10] sm:$0xff]  ;;  %s1639_s19 = sshll.u32 %s1636_s18, 4  ;;  %s1640_s19 = int_to_ptr.hbm [resolvable:$true] %s1639_s19 }
  0x26   : > { %415 = vmatpush.bf16.msrb.mxu2 %v405_v34  ;;  %1788 = vmatmul.msk.bf16.vlgmr.msra.gmra.mxu1 %vm269_vm1, %v2217_v32  ;;  %v1921_v30 = vor.u32 %v2237_v27, %v1918_v29  ;;  %v2226_v32 = vld [vmem:[%s2542_s9 + $0x10] sm:$0xff]  ;;  %v2246_v34 = vld [vmem:[%s3172_s1 + $0xa4] sm:$0xf0]  ;;  %v1971_v37 = vld [vmem:[%s3172_s1 + $0xa8] sm:$0xf0]  ;;  %s2359_s23 = sshra.s32 %s1640_s19, 4  ;;  %s2360_s23 = int_to_ptr.hbm [resolvable:$true] %s2359_s23 }
  0x27   : > { %444 = vmatpush.bf16.msrb.mxu3 %v408_v35  ;;  %556 = vmatpush.bf16.msrb.mxu0 %v546_v41  ;;  %v2245_v35 = vld [vmem:[%s3172_s1 + $0xa4] sm:$0xf]  ;;  %v2227_v40 = vld [vmem:[%s2542_s9 + $0x18] sm:$0xff]  ;;  %v2003_v41 = vld [vmem:[%s3172_s1 + $0xe8] sm:$0x33]  ;;  %s2361_s26 = scalar_lea.hbm %s2360_s23, 128  ;;  %p2366_p1 = scmp.lt.s32.totalorder %s2360_s23, %s3174_s3 }
  0x28   : > { %1790 = vmatmul.msk.bf16.vlgmr.msra.gmra.mxu3 %vm269_vm1, %v2219_v33  ;;  %585 = vmatpush.bf16.msrb.mxu1 %v549_v42  ;;  %v1969_v33 = vld [vmem:[%s3172_s1 + $0xa0] sm:$0xf]  ;;  %v1974_v38 = vor.u32 %v2245_v35, %v1971_v37  ;;  %v2056_v42 = vld [vmem:[%s3172_s1 + $0x110] sm:$0x33]  ;;  %v2212_v55 = vld [vmem:[%s2542_s9 + $0x18] sm:$0xff]  ;;  %p2362_p12 = scmp.ne.s32.totalorder %s2360_s23, %s2361_s26  ;;  %p2367_p2 = scmp.lt.s32.totalorder %s2365_s29, %s2361_s26 }
  0x29   : > { %v1970_v36 = vor.u32 %v2246_v34, %v1969_v33  ;;  %v1149_v45 = vunpack.c.l.b16 %v2056_v42  ;;  %v1150_v46 = vunpack.c.h.b16 %v2056_v42  ;;  %v2228_v56 = vld [vmem:[%s2542_s9 + $0x20] sm:$0xff]  ;;  %v2030_v57 = vld [vmem:[%s3172_s1 + $0xd8] sm:$0xf]  ;;  %v2233_v63 = vld [vmem:[%s2542_s9 + $0xc] sm:$0xff] }
  0x2a   : > { %416 = vmatpush.bf16.msrb.mxu2 %v1819_v43  ;;  %v992_v43 = vunpack.c.l.b16 %v2003_v41  ;;  %v2032_v61 = vld [vmem:[%s3172_s1 + $0xe0] sm:$0xf0]  ;;  %v2241_v0 = vld [vmem:[%s2542_s9 + $0x10] sm:$0xff]  ;;  %v2083_v1 = vld [vmem:[%s3172_s1 + $0x100] sm:$0xf]  ;;  %p2363_p13 = pnand %p2362_p12, %p2487_p4  ;;  %p2368_p3 = por %p2367_p2, %p2366_p1 }
  0x2b   : > { %445 = vmatpush.bf16.msrb.mxu3 %v1823_v44  ;;  %557 = vmatpush.bf16.msrb.mxu0 %v1872_v49  ;;  %v993_v44 = vunpack.c.h.b16 %v2003_v41  ;;  %v1155_v49 = vpack.c.b16 %v1149_v45, %v1149_v45  ;;  %v2264_v2 = vld [vmem:[%s3172_s1 + $0x104] sm:$0xf0]  ;;  %v2253_v11 = vld [vmem:[%s3172_s1 + $0xcc] sm:$0xf]  ;;  %v2024_v13 = vld [vmem:[%s3172_s1 + $0xd0] sm:$0xf0] }
  0x2c   : > { %586 = vmatpush.bf16.msrb.mxu1 %v1876_v50  ;;  %v998_v47 = vpack.c.b16 %v992_v43, %v992_v43  ;;  %v1156_v50 = vpack.c.b16 %v1150_v46, %v1150_v46  ;;  %v2075_v15 = vld [vmem:[%s3172_s1 + $0xf0] sm:$0xf]  ;;  %v2262_v16 = vld [vmem:[%s3172_s1 + $0xf4] sm:$0xf0]  ;;  %v2261_v17 = vld [vmem:[%s3172_s1 + $0xf4] sm:$0xf]  ;;  %p2364_p0 = pneg %p2363_p13 }
  0x2d   : > { %v999_v48 = vpack.c.b16 %v993_v44, %v993_v44  ;;  %v1174_v53 = vsel %vm282_vm0, %v1155_v49, 0  ;;  %v2235_v21 = vld [vmem:[%s2542_s9 + $0x1c] sm:$0xff]  ;;  %v2236_v45 = vld [vmem:[%s2542_s9 + $0x24] sm:$0xff] }
  0x2e   : > { %417 = vmatpush.bf16.msrb.mxu2 %v1811_v58  ;;  %v1017_v51 = vsel %vm282_vm0, %v998_v47, 0  ;;  %v1177_v54 = vsel %vm282_vm0, %v1156_v50, 0  ;;  %v2256_v58 = vld [vmem:[%s3172_s1 + $0xdc] sm:$0xf0]  ;;  %v2109_v25 = vld [vmem:[%s3172_s1 + $0x138] sm:$0x33]  ;;  %p2369_p5 = pnand %p2368_p3, %p2364_p0 }
  0x2f   : > { %446 = vmatpush.bf16.msrb.mxu3 %v1815_v59  ;;  %558 = vmatpush.bf16.msrb.mxu0 %v1864_v3  ;;  %v1020_v52 = vsel %vm282_vm0, %v999_v48, 0  ;;  %v2255_v59 = vld [vmem:[%s3172_s1 + $0xdc] sm:$0xf]  ;;  %v2031_v60 = vor.u32 %v2256_v58, %v2030_v57  ;;  %v2263_v3 = vld [vmem:[%s3172_s1 + $0x104] sm:$0xf]  ;;  %v1306_v26 = vunpack.c.l.b16 %v2109_v25  ;;  %v1307_v27 = vunpack.c.h.b16 %v2109_v25  ;;  %v2244_v46 = vld [vmem:[%s2542_s9 + $0x28] sm:$0xff] }
  0x30   : > { %587 = vmatpush.bf16.msrb.mxu1 %v1868_v4  ;;  %v2035_v62 = vor.u32 %v2255_v59, %v2032_v61  ;;  %v2084_v4 = vor.u32 %v2264_v2, %v2083_v1  ;;  %v2138_v57 = vld [vmem:[%s3172_s1 + $0x130] sm:$0xf0]  ;;  %v2189_v1 = vld [vmem:[%s3172_s1 + $0x150] sm:$0xf]  ;;  %v2280_v2 = vld [vmem:[%s3172_s1 + $0x154] sm:$0xf0] }
  0x31   : > { %v2249_v61 = vld [vmem:[%s2542_s9 + $0x14] sm:$0xff] }
  0x32   : > { %713 = vmatpush.bf16.msra.mxu2 %v703_v5  ;;  %v2085_v5 = vld [vmem:[%s3172_s1 + $0x108] sm:$0xf0] }
  0x33   : > { %742 = vmatpush.bf16.msra.mxu3 %v706_v6  ;;  %870 = vmatpush.bf16.msra.mxu0 %v860_v7  ;;  %v2088_v6 = vor.u32 %v2263_v3, %v2085_v5  ;;  %v2234_v7 = vld [vmem:[%s2542_s9 + $0x14] sm:$0xff]  ;;  %v2191_v5 = vld [vmem:[%s3172_s1 + $0x158] sm:$0xf0] }
  0x34   : > { %899 = vmatpush.bf16.msra.mxu1 %v863_v8  ;;  %v2242_v8 = vld [vmem:[%s2542_s9 + $0x18] sm:$0xff]  ;;  %v2279_v3 = vld [vmem:[%s3172_s1 + $0x154] sm:$0xf] }
  0x35   : > { %1785 = vmatmul.msk.bf16.gmra.mxu0 %vm269_vm1, %v2218_v9  ;;  %1787 = vmatmul.msk.bf16.gmra.mxu2 %vm269_vm1, %v2220_v10 }
  0x36   : > { %1789 = vmatmul.msk.bf16.gmra.mxu1 %vm269_vm1, %v2218_v9  ;;  %714 = vmatpush.bf16.msra.mxu2 %v1925_v14  ;;  %v2022_v9 = vld [vmem:[%s3172_s1 + $0xc8] sm:$0xf]  ;;  %v2027_v14 = vor.u32 %v2253_v11, %v2024_v13 }
  0x37   : > { %743 = vmatpush.bf16.msra.mxu3 %v1929_v18  ;;  %871 = vmatpush.bf16.msra.mxu0 %v1978_v19  ;;  %v2076_v18 = vor.u32 %v2262_v16, %v2075_v15  ;;  %v2077_v19 = vld [vmem:[%s3172_s1 + $0xf8] sm:$0xf0] }
  0x38   : > { %1791 = vmatmul.msk.bf16.gmra.mxu3 %vm269_vm1, %v2220_v10  ;;  %900 = vmatpush.bf16.msra.mxu1 %v1982_v22  ;;  %v2254_v10 = vld [vmem:[%s3172_s1 + $0xcc] sm:$0xf0]  ;;  %v2080_v20 = vor.u32 %v2261_v17, %v2077_v19  ;;  %v2243_v22 = vld [vmem:[%s2542_s9 + $0x20] sm:$0xff] }
  0x39   : > { %v2023_v12 = vor.u32 %v2254_v10, %v2022_v9  ;;  %v2258_v19 = vld [vmem:[%s2542_s9 + $0x20] sm:$0xff] }
  0x3a   : > { %715 = vmatpush.bf16.msra.mxu2 %v1917_v28 }
  0x3b   : > { %744 = vmatpush.bf16.msra.mxu3 %v1921_v30  ;;  %872 = vmatpush.bf16.msra.mxu0 %v1970_v36  ;;  %v1312_v30 = vpack.c.b16 %v1306_v26, %v1306_v26  ;;  %v2162_v36 = vld [vmem:[%s3172_s1 + $0x160] sm:$0x33] }
  0x3c   : > { %901 = vmatpush.bf16.msra.mxu1 %v1974_v38  ;;  %v1463_v37 = vunpack.c.l.b16 %v2162_v36  ;;  %v1464_v38 = vunpack.c.h.b16 %v2162_v36 }
  0x3d   : > { %v1331_v34 = vsel %vm282_vm0, %v1312_v30, 0 }
  0x45   : > { %1824 = vmatmul.msk.bf16.vlgmr.msrb.gmra.mxu2 %vm269_vm1, %v2209_v23  ;;  %1877 = vmatmul.msk.bf16.vlgmr.msrb.gmra.mxu0 %vm269_vm1, %v2225_v24 }
  0x46   : > { %1881 = vmatmul.msk.bf16.vlgmr.msrb.gmra.mxu1 %vm269_vm1, %v2225_v24  ;;  %1027 = vmatpush.bf16.msrb.mxu2 %v1017_v51 }
  0x47   : > { %1184 = vmatpush.bf16.msrb.mxu0 %v1174_v53  ;;  %1213 = vmatpush.bf16.msrb.mxu1 %v1177_v54  ;;  %v2136_v53 = vld [vmem:[%s3172_s1 + $0x128] sm:$0xf]  ;;  %v2272_v54 = vld [vmem:[%s3172_s1 + $0x12c] sm:$0xf0] }
  0x48   : > { %1828 = vmatmul.msk.bf16.vlgmr.msrb.gmra.mxu3 %vm269_vm1, %v2209_v23 }
  0x49   : > { %1056 = vmatpush.bf16.msrb.mxu3 %v1020_v52 }
  0x4a   : > { %1028 = vmatpush.bf16.msrb.mxu2 %v2031_v60 }
  0x4b   : > { %1185 = vmatpush.bf16.msrb.mxu0 %v2084_v4  ;;  %1214 = vmatpush.bf16.msrb.mxu1 %v2088_v6  ;;  %v2190_v4 = vor.u32 %v2280_v2, %v2189_v1  ;;  %v2194_v6 = vor.u32 %v2279_v3, %v2191_v5 }
  0x4d   : > { %1057 = vmatpush.bf16.msrb.mxu3 %v2035_v62  ;;  %v2257_v62 = vld [vmem:[%s2542_s9 + $0x18] sm:$0xff] }
  0x4e   : > { %1029 = vmatpush.bf16.msrb.mxu2 %v2023_v12 }
  0x4f   : > { %1186 = vmatpush.bf16.msrb.mxu0 %v2076_v18  ;;  %1215 = vmatpush.bf16.msrb.mxu1 %v2080_v20  ;;  %v2250_v18 = vld [vmem:[%s2542_s9 + $0x1c] sm:$0xff] }
  0x51   : > { %1058 = vmatpush.bf16.msrb.mxu3 %v2027_v14 }
  0x55   : > { %1825 = vmatmul.msk.bf16.gmra.mxu2 %vm269_vm1, %v2210_v31  ;;  %1878 = vmatmul.msk.bf16.gmra.mxu0 %vm269_vm1, %v2226_v32 }
  0x56   : > { %1882 = vmatmul.msk.bf16.gmra.mxu1 %vm269_vm1, %v2226_v32 }
  0x58   : > { %1829 = vmatmul.msk.bf16.gmra.mxu3 %vm269_vm1, %v2210_v31  ;;  %v1313_v31 = vpack.c.b16 %v1307_v27, %v1307_v27  ;;  %v2130_v27 = vld [vmem:[%s3172_s1 + $0x120] sm:$0xf0] }
  0x5a   : > { %v1334_v35 = vsel %vm282_vm0, %v1313_v31, 0 }
  0x65   : > { %1826 = vmatmul.msk.bf16.gmra.mxu2 %vm269_vm1, %v2211_v39  ;;  %1879 = vmatmul.msk.bf16.gmra.mxu0 %vm269_vm1, %v2227_v40 }
  0x66   : > { %1883 = vmatmul.msk.bf16.gmra.mxu1 %vm269_vm1, %v2227_v40  ;;  %v1470_v40 = vpack.c.b16 %v1464_v38, %v1464_v38  ;;  %v2181_v38 = vld [vmem:[%s3172_s1 + $0x140] sm:$0xf] }
  0x68   : > { %1830 = vmatmul.msk.bf16.gmra.mxu3 %vm269_vm1, %v2211_v39  ;;  %v1469_v39 = vpack.c.b16 %v1463_v37, %v1463_v37  ;;  %v1491_v43 = vsel %vm282_vm0, %v1470_v40, 0  ;;  %v2277_v40 = vld [vmem:[%s3172_s1 + $0x144] sm:$0xf] }
  0x6a   : > { %v1488_v42 = vsel %vm282_vm0, %v1469_v39, 0  ;;  %v2278_v39 = vld [vmem:[%s3172_s1 + $0x144] sm:$0xf0] }
  0x75   : > { %1827 = vmatmul.msk.bf16.gmra.mxu2 %vm269_vm1, %v2212_v55  ;;  %1880 = vmatmul.msk.bf16.gmra.mxu0 %vm269_vm1, %v2228_v56 }
  0x76   : > { %1884 = vmatmul.msk.bf16.gmra.mxu1 %vm269_vm1, %v2228_v56  ;;  %v2137_v56 = vor.u32 %v2272_v54, %v2136_v53 }
  0x78   : > { %1831 = vmatmul.msk.bf16.gmra.mxu3 %vm269_vm1, %v2212_v55  ;;  %v2271_v55 = vld [vmem:[%s3172_s1 + $0x12c] sm:$0xf] }
  0x79   : > { %v2141_v58 = vor.u32 %v2271_v55, %v2138_v57  ;;  %v2259_v57 = vld [vmem:[%s2542_s9 + $0x28] sm:$0xff] }
  0x85   : > { %1930 = vmatmul.msk.bf16.vlgmr.msra.gmra.mxu2 %vm269_vm1, %v2233_v63  ;;  %1983 = vmatmul.msk.bf16.vlgmr.msra.gmra.mxu0 %vm269_vm1, %v2241_v0 }
  0x86   : > { %1987 = vmatmul.msk.bf16.vlgmr.msra.gmra.mxu1 %vm269_vm1, %v2241_v0  ;;  %1341 = vmatpush.bf16.msra.mxu2 %v1331_v34 }
  0x87   : > { %1498 = vmatpush.bf16.msra.mxu0 %v1488_v42  ;;  %1527 = vmatpush.bf16.msra.mxu1 %v1491_v43  ;;  %v2182_v43 = vor.u32 %v2278_v39, %v2181_v38 }
  0x88   : > { %1934 = vmatmul.msk.bf16.vlgmr.msra.gmra.mxu3 %vm269_vm1, %v2233_v63 }
  0x89   : > { %1370 = vmatpush.bf16.msra.mxu3 %v1334_v35 }
  0x8a   : > { %1342 = vmatpush.bf16.msra.mxu2 %v2137_v56  ;;  %v2251_v56 = vld [vmem:[%s2542_s9 + $0x24] sm:$0xff] }
  0x8b   : > { %1499 = vmatpush.bf16.msra.mxu0 %v2190_v4  ;;  %1528 = vmatpush.bf16.msra.mxu1 %v2194_v6 }
  0x8d   : > { %1371 = vmatpush.bf16.msra.mxu3 %v2141_v58 }
  0x8f   : > { %1500 = vmatpush.bf16.msra.mxu0 %v2182_v43 }
  0x95   : > { %1931 = vmatmul.msk.bf16.gmra.mxu2 %vm269_vm1, %v2234_v7  ;;  %1984 = vmatmul.msk.bf16.gmra.mxu0 %vm269_vm1, %v2242_v8 }
  0x96   : > { %1988 = vmatmul.msk.bf16.gmra.mxu1 %vm269_vm1, %v2242_v8 }
  0x98   : > { %1935 = vmatmul.msk.bf16.gmra.mxu3 %vm269_vm1, %v2234_v7 }
  0xa2   : > { %v2762_v23 = vpop.f32.mrf.mxu0 }
  0xa3   : > { %v2764_v24 = vpop.f32.mrf.mxu1 }
  0xa5   : > { %1932 = vmatmul.msk.bf16.gmra.mxu2 %vm269_vm1, %v2235_v21  ;;  %1985 = vmatmul.msk.bf16.gmra.mxu0 %vm269_vm1, %v2243_v22 }
  0xa6   : > { %1989 = vmatmul.msk.bf16.gmra.mxu1 %vm269_vm1, %v2243_v22  ;;  %v2128_v22 = vld [vmem:[%s3172_s1 + $0x118] sm:$0xf] }
  0xa8   : > { %1936 = vmatmul.msk.bf16.gmra.mxu3 %vm269_vm1, %v2235_v21  ;;  %v2773_v28 = vpop.f32.mrf.mxu2 }
  0xaa   : > { %v2777_v32 = vpop.f32.mrf.mxu0 }
  0xab   : > { %v2775_v29 = vpop.f32.mrf.mxu3  ;;  %v2779_v33 = vpop.f32.mrf.mxu1 }
  0xb0   : > { %v2786_v41 = vpop.f32.mrf.mxu2 }
  0xb2   : > { %v2794_v47 = vpop.f32.mrf.mxu0 }
  0xb3   : > { %v2790_v44 = vpop.f32.mrf.mxu3  ;;  %v2796_v48 = vpop.f32.mrf.mxu1 }
  0xb5   : > { %1933 = vmatmul.msk.bf16.gmra.mxu2 %vm269_vm1, %v2236_v45  ;;  %1986 = vmatmul.msk.bf16.gmra.mxu0 %vm269_vm1, %v2244_v46 }
  0xb6   : > { %1990 = vmatmul.msk.bf16.gmra.mxu1 %vm269_vm1, %v2244_v46 }
  0xb8   : > { %1937 = vmatmul.msk.bf16.gmra.mxu3 %vm269_vm1, %v2236_v45  ;;  %v2802_v49 = vpop.f32.mrf.mxu2  ;;  %v2183_v45 = vld [vmem:[%s3172_s1 + $0x148] sm:$0xf0] }
  0xba   : > { %v2806_v51 = vpop.f32.mrf.mxu0 }
  0xbb   : > { %v2804_v50 = vpop.f32.mrf.mxu3  ;;  %v2808_v52 = vpop.f32.mrf.mxu1 }
  0xc0   : > { %v2822_v59 = vpop.f32.mrf.mxu2 }
  0xc2   : > { %v560_v63 = vpop.f32.mrf.mxu0 }
  0xc3   : > { %v2824_v60 = vpop.f32.mrf.mxu3  ;;  %v589_v0 = vpop.f32.mrf.mxu1 }
  0xc5   : > { %2036 = vmatmul.msk.bf16.vlgmr.msrb.gmra.mxu2 %vm269_vm1, %v2249_v61  ;;  %2089 = vmatmul.msk.bf16.vlgmr.msrb.gmra.mxu0 %vm269_vm1, %v2257_v62 }
  0xc6   : > { %2093 = vmatmul.msk.bf16.vlgmr.msrb.gmra.mxu1 %vm269_vm1, %v2257_v62 }
  0xc8   : > { %2040 = vmatmul.msk.bf16.vlgmr.msrb.gmra.mxu3 %vm269_vm1, %v2249_v61  ;;  %v419_v7 = vpop.f32.mrf.mxu2 }
  0xc9   : > { %v420_v8 = vadd.f32 %v419_v7, %v2762_v23  ;;  %v2270_v23 = vld [vmem:[%s3172_s1 + $0x11c] sm:$0xf0] }
  0xca   : > { %v562_v11 = vpop.f32.mrf.mxu0  ;;  %v2129_v26 = vor.u32 %v2270_v23, %v2128_v22 }
  0xcb   : > { %v448_v9 = vpop.f32.mrf.mxu3  ;;  %v591_v12 = vpop.f32.mrf.mxu1  ;;  %v2846_v13 = vadd.f32 %v560_v63, %v420_v8 }
  0xcc   : > { %v449_v10 = vadd.f32 %v448_v9, %v2764_v24  ;;  %v2269_v24 = vld [vmem:[%s3172_s1 + $0x11c] sm:$0xf]  ;;  %1343 = vmatpush.bf16.msra.mxu2 %v2129_v26 }
  0xcd   : > { %v2133_v31 = vor.u32 %v2269_v24, %v2130_v27  ;;  %v2265_v26 = vld [vmem:[%s2542_s9 + $0x1c] sm:$0xff] }
  0xce   : > { %v2848_v14 = vadd.f32 %v589_v0, %v449_v10  ;;  %v2252_v10 = vld [vmem:[%s2542_s9 + $0x2c] sm:$0xff]  ;;  %v2273_v27 = vld [vmem:[%s2542_s9 + $0x20] sm:$0xff] }
  0xcf   : > { %1372 = vmatpush.bf16.msra.mxu3 %v2133_v31 }
  0xd0   : > { %v421_v15 = vpop.f32.mrf.mxu2 }
  0xd1   : > { %v422_v16 = vadd.f32 %v421_v15, %v2777_v32 }
  0xd2   : > { %v565_v21 = vpop.f32.mrf.mxu0 }
  0xd3   : > { %v450_v17 = vpop.f32.mrf.mxu3  ;;  %v594_v25 = vpop.f32.mrf.mxu1  ;;  %v2866_v30 = vadd.f32 %v562_v11, %v422_v16  ;;  %v2260_v11 = vld [vmem:[%s2542_s9 + $0x30] sm:$0xff] }
  0xd4   : > { %v451_v20 = vadd.f32 %v450_v17, %v2779_v33 }
  0xd5   : > { %2037 = vmatmul.msk.bf16.gmra.mxu2 %vm269_vm1, %v2250_v18  ;;  %2090 = vmatmul.msk.bf16.gmra.mxu0 %vm269_vm1, %v2258_v19 }
  0xd6   : > { %v2868_v32 = vadd.f32 %v591_v12, %v451_v20  ;;  %2094 = vmatmul.msk.bf16.gmra.mxu1 %vm269_vm1, %v2258_v19 }
  0xd8   : > { %2041 = vmatmul.msk.bf16.gmra.mxu3 %vm269_vm1, %v2250_v18  ;;  %v424_v33 = vpop.f32.mrf.mxu2 }
  0xd9   : > { %v425_v34 = vadd.f32 %v424_v33, %v2794_v47  ;;  %v2186_v47 = vor.u32 %v2277_v40, %v2183_v45 }
  0xda   : > { %v567_v37 = vpop.f32.mrf.mxu0 }
  0xdb   : > { %v453_v35 = vpop.f32.mrf.mxu3  ;;  %v596_v42 = vpop.f32.mrf.mxu1  ;;  %v2888_v46 = vadd.f32 %v565_v21, %v425_v34  ;;  %1529 = vmatpush.bf16.msra.mxu1 %v2186_v47  ;;  %v2266_v47 = vld [vmem:[%s2542_s9 + $0x24] sm:$0xff] }
  0xdc   : > { %v454_v36 = vadd.f32 %v453_v35, %v2796_v48 }
  0xde   : > { %v2890_v48 = vadd.f32 %v594_v25, %v454_v36 }
  0xe0   : > { %v426_v53 = vpop.f32.mrf.mxu2 }
  0xe1   : > { %v427_v54 = vadd.f32 %v426_v53, %v2806_v51  ;;  %v2274_v53 = vld [vmem:[%s2542_s9 + $0x28] sm:$0xff] }
  0xe2   : > { %v570_v61 = vpop.f32.mrf.mxu0 }
  0xe3   : > { %v455_v55 = vpop.f32.mrf.mxu3  ;;  %v599_v62 = vpop.f32.mrf.mxu1  ;;  %v2896_v63 = vadd.f32 %v567_v37, %v427_v54 }
  0xe4   : > { %v456_v58 = vadd.f32 %v455_v55, %v2808_v52 }
  0xe5   : > { %2038 = vmatmul.msk.bf16.gmra.mxu2 %vm269_vm1, %v2251_v56  ;;  %2091 = vmatmul.msk.bf16.gmra.mxu0 %vm269_vm1, %v2259_v57 }
  0xe6   : > { %v2898_v0 = vadd.f32 %v596_v42, %v456_v58  ;;  %2095 = vmatmul.msk.bf16.gmra.mxu1 %vm269_vm1, %v2259_v57 }
  0xe8   : > { %2042 = vmatmul.msk.bf16.gmra.mxu3 %vm269_vm1, %v2251_v56  ;;  %v429_v51 = vpop.f32.mrf.mxu2 }
  0xe9   : > { %v430_v1 = vadd.f32 %v429_v51, %v2773_v28 }
  0xea   : > { %v572_v3 = vpop.f32.mrf.mxu0 }
  0xeb   : > { %v458_v52 = vpop.f32.mrf.mxu3  ;;  %v601_v4 = vpop.f32.mrf.mxu1  ;;  %v2906_v5 = vadd.f32 %v570_v61, %v430_v1 }
  0xec   : > { %v459_v2 = vadd.f32 %v458_v52, %v2775_v29 }
  0xee   : > { %v2908_v6 = vadd.f32 %v599_v62, %v459_v2 }
  0xf0   : > { %v431_v7 = vpop.f32.mrf.mxu2 }
  0xf1   : > { %v432_v8 = vadd.f32 %v431_v7, %v2786_v41  ;;  %v2275_v7 = vld [vmem:[%s2542_s9 + $0x30] sm:$0xff] }
  0xf2   : > { %v575_v15 = vpop.f32.mrf.mxu0 }
  0xf3   : > { %v460_v9 = vpop.f32.mrf.mxu3  ;;  %v604_v16 = vpop.f32.mrf.mxu1  ;;  %v2914_v28 = vadd.f32 %v572_v3, %v432_v8 }
  0xf4   : > { %v461_v12 = vadd.f32 %v460_v9, %v2790_v44 }
  0xf5   : > { %2039 = vmatmul.msk.bf16.gmra.mxu2 %vm269_vm1, %v2252_v10  ;;  %2092 = vmatmul.msk.bf16.gmra.mxu0 %vm269_vm1, %v2260_v11 }
  0xf6   : > { %v2916_v17 = vadd.f32 %v601_v4, %v461_v12  ;;  %2096 = vmatmul.msk.bf16.gmra.mxu1 %vm269_vm1, %v2260_v11  ;;  %v2267_v4 = vld [vmem:[%s2542_s9 + $0x2c] sm:$0xff] }
  0xf8   : > { %2043 = vmatmul.msk.bf16.gmra.mxu3 %vm269_vm1, %v2252_v10  ;;  %v434_v29 = vpop.f32.mrf.mxu2 }
  0xf9   : > { %v435_v41 = vadd.f32 %v434_v29, %v2802_v49 }
  0xfa   : > { %v577_v19 = vpop.f32.mrf.mxu0 }
  0xfb   : > { %v463_v44 = vpop.f32.mrf.mxu3  ;;  %v606_v20 = vpop.f32.mrf.mxu1  ;;  %v2924_v21 = vadd.f32 %v575_v15, %v435_v41 }
  0xfc   : > { %v464_v18 = vadd.f32 %v463_v44, %v2804_v50 }
  0xfe   : > { %v2926_v22 = vadd.f32 %v604_v16, %v464_v18 }
 0x100   : > { %v436_v23 = vpop.f32.mrf.mxu2 }
 0x101   : > { %v437_v24 = vadd.f32 %v436_v23, %v2822_v59  ;;  %v2276_v23 = vld [vmem:[%s2542_s9 + $0x38] sm:$0xff] }
 0x102   : > { %v874_v33 = vpop.f32.mrf.mxu0 }
 0x103   : > { %v465_v25 = vpop.f32.mrf.mxu3  ;;  %v903_v34 = vpop.f32.mrf.mxu1  ;;  %v2932_v49 = vadd.f32 %v577_v19, %v437_v24 }
 0x104   : > { %v466_v31 = vadd.f32 %v465_v25, %v2824_v60 }
 0x105   : > { %2142 = vmatmul.msk.bf16.vlgmr.msra.gmra.mxu2 %vm269_vm1, %v2265_v26  ;;  %2195 = vmatmul.msk.bf16.vlgmr.msra.gmra.mxu0 %vm269_vm1, %v2273_v27 }
 0x106   : > { %v2934_v35 = vadd.f32 %v606_v20, %v466_v31  ;;  %2199 = vmatmul.msk.bf16.vlgmr.msra.gmra.mxu1 %vm269_vm1, %v2273_v27  ;;  %v2268_v20 = vld [vmem:[%s2542_s9 + $0x34] sm:$0xff] }
 0x108   : > { %2146 = vmatmul.msk.bf16.vlgmr.msra.gmra.mxu3 %vm269_vm1, %v2265_v26  ;;  %v717_v50 = vpop.f32.mrf.mxu2 }
 0x109   : > { %v766_v59 = vadd.f32 %v717_v50, %v2846_v13 }
 0x10a   : > { %v876_v37 = vpop.f32.mrf.mxu0 }
 0x10b   : > { %v746_v60 = vpop.f32.mrf.mxu3  ;;  %v905_v38 = vpop.f32.mrf.mxu1  ;;  %v2942_v39 = vadd.f32 %v874_v33, %v766_v59 }
 0x10c   : > { %v767_v36 = vadd.f32 %v746_v60, %v2848_v14 }
 0x10e   : > { %v2944_v40 = vadd.f32 %v903_v34, %v767_v36 }
 0x110   : > { %v719_v42 = vpop.f32.mrf.mxu2 }
 0x111   : > { %v768_v43 = vadd.f32 %v719_v42, %v2866_v30 }
 0x112   : > { %v879_v55 = vpop.f32.mrf.mxu0 }
 0x113   : > { %v748_v45 = vpop.f32.mrf.mxu3  ;;  %v908_v56 = vpop.f32.mrf.mxu1  ;;  %v2950_v13 = vadd.f32 %v876_v37, %v768_v43 }
 0x114   : > { %v769_v54 = vadd.f32 %v748_v45, %v2868_v32 }
 0x115   : > { %2143 = vmatmul.msk.bf16.gmra.mxu2 %vm269_vm1, %v2266_v47  ;;  %2196 = vmatmul.msk.bf16.gmra.mxu0 %vm269_vm1, %v2274_v53 }
 0x116   : > { %v2952_v57 = vadd.f32 %v905_v38, %v769_v54  ;;  %2200 = vmatmul.msk.bf16.gmra.mxu1 %vm269_vm1, %v2274_v53 }
 0x118   : > { %2147 = vmatmul.msk.bf16.gmra.mxu3 %vm269_vm1, %v2266_v47  ;;  %v722_v14 = vpop.f32.mrf.mxu2 }
 0x119   : > { %v770_v30 = vadd.f32 %v722_v14, %v2888_v46 }
 0x11a   : > { %v881_v61 = vpop.f32.mrf.mxu0 }
 0x11b   : > { %v751_v32 = vpop.f32.mrf.mxu3  ;;  %v910_v62 = vpop.f32.mrf.mxu1  ;;  %v2960_v51 = vadd.f32 %v879_v55, %v770_v30 }
 0x11c   : > { %v771_v58 = vadd.f32 %v751_v32, %v2890_v48 }
 0x11e   : > { %v2962_v1 = vadd.f32 %v908_v56, %v771_v58 }
 0x120   : > { %v724_v52 = vpop.f32.mrf.mxu2 }
 0x121   : > { %v772_v2 = vadd.f32 %v724_v52, %v2896_v63 }
 0x122   : > { %v884_v9 = vpop.f32.mrf.mxu0 }
 0x123   : > { %v753_v3 = vpop.f32.mrf.mxu3  ;;  %v913_v10 = vpop.f32.mrf.mxu1  ;;  %v2968_v46 = vadd.f32 %v881_v61, %v772_v2 }
 0x124   : > { %v773_v8 = vadd.f32 %v753_v3, %v2898_v0 }
 0x125   : > { %2144 = vmatmul.msk.bf16.gmra.mxu2 %vm269_vm1, %v2267_v4  ;;  %2197 = vmatmul.msk.bf16.gmra.mxu0 %vm269_vm1, %v2275_v7 }
 0x126   : > { %v2970_v11 = vadd.f32 %v910_v62, %v773_v8  ;;  %2201 = vmatmul.msk.bf16.gmra.mxu1 %vm269_vm1, %v2275_v7 }
 0x128   : > { %2148 = vmatmul.msk.bf16.gmra.mxu3 %vm269_vm1, %v2267_v4  ;;  %v727_v48 = vpop.f32.mrf.mxu2 }
 0x129   : > { %v774_v63 = vadd.f32 %v727_v48, %v2906_v5 }
 0x12a   : > { %v886_v15 = vpop.f32.mrf.mxu0 }
 0x12b   : > { %v756_v0 = vpop.f32.mrf.mxu3  ;;  %v915_v16 = vpop.f32.mrf.mxu1  ;;  %v2978_v29 = vadd.f32 %v884_v9, %v774_v63 }
 0x12c   : > { %v775_v12 = vadd.f32 %v756_v0, %v2908_v6 }
 0x12e   : > { %v2980_v41 = vadd.f32 %v913_v10, %v775_v12 }
 0x130   : > { %v729_v44 = vpop.f32.mrf.mxu2 }
 0x131   : > { %v776_v18 = vadd.f32 %v729_v44, %v2914_v28 }
 0x132   : > { %v889_v25 = vpop.f32.mrf.mxu0 }
 0x133   : > { %v758_v19 = vpop.f32.mrf.mxu3  ;;  %v918_v26 = vpop.f32.mrf.mxu1  ;;  %v2986_v5 = vadd.f32 %v886_v15, %v776_v18 }
 0x134   : > { %v777_v24 = vadd.f32 %v758_v19, %v2916_v17 }
 0x135   : > { %2145 = vmatmul.msk.bf16.gmra.mxu2 %vm269_vm1, %v2268_v20  ;;  %2198 = vmatmul.msk.bf16.gmra.mxu0 %vm269_vm1, %v2276_v23 }
 0x136   : > { %v2988_v27 = vadd.f32 %v915_v16, %v777_v24  ;;  %2202 = vmatmul.msk.bf16.gmra.mxu1 %vm269_vm1, %v2276_v23 }
 0x138   : > { %2149 = vmatmul.msk.bf16.gmra.mxu3 %vm269_vm1, %v2268_v20  ;;  %v732_v6 = vpop.f32.mrf.mxu2 }
 0x139   : > { %v778_v28 = vadd.f32 %v732_v6, %v2924_v21 }
 0x13a   : > { %v891_v33 = vpop.f32.mrf.mxu0 }
 0x13b   : > { %v761_v31 = vpop.f32.mrf.mxu3  ;;  %v920_v34 = vpop.f32.mrf.mxu1  ;;  %v2996_v50 = vadd.f32 %v889_v25, %v778_v28  ;;  %v1567_v25 = vld [vmem:[%s3173_s2] sm:$0x3] }
 0x13c   : > { %v779_v17 = vadd.f32 %v761_v31, %v2926_v22 }
 0x13e   : > { %v2998_v59 = vadd.f32 %v918_v26, %v779_v17  ;;  %v3056_v17 = vperm.slane %v1567_v25, 0 }
 0x140   : > { %v734_v60 = vpop.f32.mrf.mxu2 }
 0x141   : > { %v780_v36 = vadd.f32 %v734_v60, %v2932_v49  ;;  %v3058_v60 = vperm.slane %v1567_v25, 1 }
 0x142   : > { %v1188_v42 = vpop.f32.mrf.mxu0 }
 0x143   : > { %v763_v37 = vpop.f32.mrf.mxu3  ;;  %v1217_v43 = vpop.f32.mrf.mxu1  ;;  %v3002_v45 = vadd.f32 %v891_v33, %v780_v36 }
 0x144   : > { %v781_v38 = vadd.f32 %v763_v37, %v2934_v35 }
 0x146   : > { %v3004_v21 = vadd.f32 %v920_v34, %v781_v38 }
 0x148   : > { %v1031_v47 = vpop.f32.mrf.mxu2 }
 0x149   : > { %v1080_v20 = vadd.f32 %v1031_v47, %v2942_v39 }
 0x14a   : > { %v1190_v53 = vpop.f32.mrf.mxu0 }
 0x14b   : > { %v1060_v22 = vpop.f32.mrf.mxu3  ;;  %v1219_v54 = vpop.f32.mrf.mxu1  ;;  %v1237_v26 = vadd.f32 %v1188_v42, %v1080_v20 }
 0x14c   : > { %v1081_v24 = vadd.f32 %v1060_v22, %v2944_v40 }
 0x14e   : > { %v1238_v28 = vadd.f32 %v1217_v43, %v1081_v24 }
 0x150   : > { %v1033_v55 = vpop.f32.mrf.mxu2 }
 0x151   : > { %v1082_v39 = vadd.f32 %v1033_v55, %v2950_v13 }
 0x152   : > { %v3006_v14 = vpop.f32.mrf.mxu0 }
 0x153   : > { %v1062_v56 = vpop.f32.mrf.mxu3  ;;  %v3008_v30 = vpop.f32.mrf.mxu1  ;;  %v1239_v20 = vadd.f32 %v1190_v53, %v1082_v39 }
 0x154   : > { %v1083_v38 = vadd.f32 %v1062_v56, %v2952_v57 }
 0x156   : > { %v1240_v25 = vadd.f32 %v1219_v54, %v1083_v38 }
 0x158   : > { %v1036_v49 = vpop.f32.mrf.mxu2 }
 0x15a   : > { %v3010_v58 = vpop.f32.mrf.mxu0 }
 0x15b   : > { %v1065_v32 = vpop.f32.mrf.mxu3  ;;  %v3012_v35 = vpop.f32.mrf.mxu1 }
 0x15c   : > { %v1085_v53 = vadd.f32 %v1065_v32, %v2962_v1 }
 0x15e   : > { %v1242_v38 = vadd.f32 %v3008_v30, %v1085_v53 }
 0x160   : > { %v3014_v61 = vpop.f32.mrf.mxu2 }
 0x161   : > { %v1086_v1 = vadd.f32 %v3014_v61, %v2968_v46 }
 0x162   : > { %v3018_v52 = vpop.f32.mrf.mxu0 }
 0x163   : > { %v3016_v62 = vpop.f32.mrf.mxu3  ;;  %v3020_v2 = vpop.f32.mrf.mxu1 }
 0x168   : > { %v3022_v3 = vpop.f32.mrf.mxu2 }
 0x16a   : > { %v3026_v7 = vpop.f32.mrf.mxu0 }
 0x16b   : > { %v3024_v4 = vpop.f32.mrf.mxu3  ;;  %v3028_v8 = vpop.f32.mrf.mxu1 }
 0x170   : > { %v3030_v9 = vpop.f32.mrf.mxu2 }
 0x172   : > { %v3034_v48 = vpop.f32.mrf.mxu0 }
 0x173   : > { %v3032_v10 = vpop.f32.mrf.mxu3  ;;  %v3036_v63 = vpop.f32.mrf.mxu1 }
 0x178   : > { %v3038_v0 = vpop.f32.mrf.mxu2 }
 0x17a   : > { %v3042_v15 = vpop.f32.mrf.mxu0 }
 0x17b   : > { %v3040_v12 = vpop.f32.mrf.mxu3  ;;  %v3044_v16 = vpop.f32.mrf.mxu1 }
 0x180   : > { %v3046_v44 = vpop.f32.mrf.mxu2 }
 0x182   : > { %v1502_v19 = vpop.f32.mrf.mxu0 }
 0x183   : > { %v3048_v18 = vpop.f32.mrf.mxu3  ;;  %v1531_v23 = vpop.f32.mrf.mxu1 }
 0x188   : > { %v1345_v6 = vpop.f32.mrf.mxu2 }
 0x189   : > { %v1394_v31 = vadd.f32 %v1345_v6, %v1237_v26 }
 0x18a   : > { %v1504_v36 = vpop.f32.mrf.mxu0 }
 0x18b   : > { %v1374_v33 = vpop.f32.mrf.mxu3  ;;  %v1551_v40 = vadd.f32 %v1502_v19, %v1394_v31  ;;  %v1533_v37 = vpop.f32.mrf.mxu1  ;;  %v1084_v19 = vadd.f32 %v1036_v49, %v2960_v51 }
 0x18c   : > { %v1395_v34 = vadd.f32 %v1374_v33, %v1238_v28 }
 0x18d   : > { %v1573_v47 = vadd.f32 %v3056_v17, %v1551_v40 }
 0x18e   : > { %v1552_v42 = vadd.f32 %v1531_v23, %v1395_v34  ;;  %v1241_v34 = vadd.f32 %v3006_v14, %v1084_v19  ;;  %v1087_v14 = vadd.f32 %v3016_v62, %v2970_v11  ;;  %v1088_v11 = vadd.f32 %v3022_v3, %v2978_v29 }
 0x18f   : > { %v1589_v22 = vmax.f32 %v1573_v47, 0.0 }
 0x190   : > { %v1574_v43 = vadd.f32 %v3058_v60, %v1552_v42  ;;  %v1347_v26 = vpop.f32.mrf.mxu2 }
 0x191   : > { %1605 = vst [vmem:[%s3066_s8] sm:$0xff] %v1589_v22  ;;  %v1396_v13 = vadd.f32 %v1347_v26, %v1239_v20  ;;  %v1243_v20 = vadd.f32 %v3010_v58, %v1086_v1 }
 0x192   : > { %v1590_v24 = vmax.f32 %v1574_v43, 0.0  ;;  %v1507_v56 = vpop.f32.mrf.mxu0 }
 0x193   : > { %v1376_v55 = vpop.f32.mrf.mxu3  ;;  %v1553_v23 = vadd.f32 %v1504_v36, %v1396_v13  ;;  %v1536_v6 = vpop.f32.mrf.mxu1 }
 0x194   : > { %1606 = vst [vmem:[%s3066_s8 + $0x8] sm:$0xff] %v1590_v24  ;;  %v1397_v57 = vadd.f32 %v1376_v55, %v1240_v25  ;;  %v1244_v25 = vadd.f32 %v3012_v35, %v1087_v14  ;;  %v1089_v55 = vadd.f32 %v3024_v4, %v2980_v41  ;;  %v1090_v4 = vadd.f32 %v3030_v9, %v2986_v5 }
 0x195   : > { %v1575_v54 = vadd.f32 %v3056_v17, %v1553_v23 }
 0x196   : > { %v1554_v28 = vadd.f32 %v1533_v37, %v1397_v57 }
 0x197   : > { %v1591_v33 = vmax.f32 %v1575_v54, 0.0  ;;  %v1246_v54 = vadd.f32 %v3020_v2, %v1089_v55 }
 0x198   : > { %v1576_v31 = vadd.f32 %v3058_v60, %v1554_v28  ;;  %v1350_v40 = vpop.f32.mrf.mxu2 }
 0x199   : > { %1607 = vst [vmem:[%s3066_s8 + $0x10] sm:$0xff] %v1591_v33  ;;  %v1398_v42 = vadd.f32 %v1350_v40, %v1241_v34  ;;  %v1091_v33 = vadd.f32 %v3032_v10, %v2988_v27  ;;  %v1092_v10 = vadd.f32 %v3038_v0, %v2996_v50 }
 0x19a   : > { %v1592_v39 = vmax.f32 %v1576_v31, 0.0  ;;  %v1509_v49 = vpop.f32.mrf.mxu0 }
 0x19b   : > { %v1379_v47 = vpop.f32.mrf.mxu3  ;;  %v1555_v32 = vadd.f32 %v1507_v56, %v1398_v42  ;;  %v1538_v36 = vpop.f32.mrf.mxu1  ;;  %v1247_v42 = vadd.f32 %v3026_v7, %v1090_v4 }
 0x19c   : > { %1608 = vst [vmem:[%s3066_s8 + $0x18] sm:$0xff] %v1592_v39  ;;  %v1399_v51 = vadd.f32 %v1379_v47, %v1242_v38 }
 0x19d   : > { %v1577_v43 = vadd.f32 %v3056_v17, %v1555_v32  ;;  %v1093_v32 = vadd.f32 %v3040_v12, %v2998_v59  ;;  %v1094_v12 = vadd.f32 %v3046_v44, %v3002_v45 }
 0x19e   : > { %v1556_v37 = vadd.f32 %v1536_v6, %v1399_v51  ;;  %v1245_v6 = vadd.f32 %v3018_v52, %v1088_v11 }
 0x19f   : > { %v1593_v22 = vmax.f32 %v1577_v43, 0.0 }
 0x1a0   : > { %v1578_v30 = vadd.f32 %v3058_v60, %v1556_v37  ;;  %v1352_v26 = vpop.f32.mrf.mxu2  ;;  %v1249_v37 = vadd.f32 %v3034_v48, %v1092_v10  ;;  %v1095_v48 = vadd.f32 %v3048_v18, %v3004_v21 }
 0x1a1   : > { %1609 = vst [vmem:[%s3066_s8 + $0x20] sm:$0xff] %v1593_v22  ;;  %v1400_v13 = vadd.f32 %v1352_v26, %v1243_v20  ;;  %v1250_v20 = vadd.f32 %v3036_v63, %v1093_v32 }
 0x1a2   : > { %v1594_v24 = vmax.f32 %v1578_v30, 0.0  ;;  %v1512_v58 = vpop.f32.mrf.mxu0  ;;  %v1252_v55 = vadd.f32 %v3044_v16, %v1095_v48 }
 0x1a3   : > { %v1381_v46 = vpop.f32.mrf.mxu3  ;;  %v1557_v62 = vadd.f32 %v1509_v49, %v1400_v13  ;;  %v1541_v19 = vpop.f32.mrf.mxu1  ;;  %v1248_v49 = vadd.f32 %v3028_v8, %v1091_v33 }
 0x1a4   : > { %1610 = vst [vmem:[%s3066_s8 + $0x28] sm:$0xff] %v1594_v24  ;;  %v1401_v61 = vadd.f32 %v1381_v46, %v1244_v25 }
 0x1a5   : > { %v1579_v56 = vadd.f32 %v3056_v17, %v1557_v62 }
 0x1a6   : > { %v1558_v57 = vadd.f32 %v1538_v36, %v1401_v61  ;;  %v1251_v61 = vadd.f32 %v3042_v15, %v1094_v12 }
 0x1a7   : > { %v1595_v23 = vmax.f32 %v1579_v56, 0.0 }
 0x1a8   : > { %v1580_v35 = vadd.f32 %v3058_v60, %v1558_v57  ;;  %v1355_v28 = vpop.f32.mrf.mxu2 }
 0x1a9   : > { %1611 = vst [vmem:[%s3066_s8 + $0x30] sm:$0xff] %v1595_v23  ;;  %v1402_v29 = vadd.f32 %v1355_v28, %v1245_v6 }
 0x1aa   : > { %v1596_v53 = vmax.f32 %v1580_v35, 0.0  ;;  %v1514_v2 = vpop.f32.mrf.mxu0 }
 0x1ab   : > { %v1384_v3 = vpop.f32.mrf.mxu3  ;;  %v1559_v31 = vadd.f32 %v1512_v58, %v1402_v29  ;;  %v1543_v38 = vpop.f32.mrf.mxu1 }
 0x1ac   : > { %1612 = vst [vmem:[%s3066_s8 + $0x38] sm:$0xff] %v1596_v53  ;;  %v1403_v41 = vadd.f32 %v1384_v3, %v1246_v54 }
 0x1ad   : > { %v1581_v52 = vadd.f32 %v3056_v17, %v1559_v31 }
 0x1ae   : > { %v1560_v34 = vadd.f32 %v1541_v19, %v1403_v41 }
 0x1af   : > { %v1597_v40 = vmax.f32 %v1581_v52, 0.0 }
 0x1b0   : > { %v1582_v39 = vadd.f32 %v3058_v60, %v1560_v34  ;;  %v1357_v51 = vpop.f32.mrf.mxu2 }
 0x1b1   : > { %1613 = vst [vmem:[%s3066_s8 + $0x40] sm:$0xff] %v1597_v40  ;;  %v1404_v5 = vadd.f32 %v1357_v51, %v1247_v42 }
 0x1b2   : > { %v1598_v47 = vmax.f32 %v1582_v39, 0.0  ;;  %v1517_v30 = vpop.f32.mrf.mxu0 }
 0x1b3   : > { %v1386_v9 = vpop.f32.mrf.mxu3  ;;  %v1561_v1 = vadd.f32 %v1514_v2, %v1404_v5  ;;  %v1546_v50 = vpop.f32.mrf.mxu1 }
 0x1b4   : > { %1614 = vst [vmem:[%s3066_s8 + $0x48] sm:$0xff] %v1598_v47  ;;  %v1405_v27 = vadd.f32 %v1386_v9, %v1248_v49 }
 0x1b5   : > { %v1583_v7 = vadd.f32 %v3056_v17, %v1561_v1 }
 0x1b6   : > { %v1562_v36 = vadd.f32 %v1543_v38, %v1405_v27 }
 0x1b7   : > { %v1599_v8 = vmax.f32 %v1583_v7, 0.0 }
 0x1b8   : > { %v1584_v14 = vadd.f32 %v3058_v60, %v1562_v36  ;;  %v1360_v22 = vpop.f32.mrf.mxu2 }
 0x1b9   : > { %1615 = vst [vmem:[%s3066_s8 + $0x50] sm:$0xff] %v1599_v8  ;;  %v1406_v0 = vadd.f32 %v1360_v22, %v1249_v37 }
 0x1ba   : > { %v1600_v43 = vmax.f32 %v1584_v14, 0.0  ;;  %v1519_v21 = vpop.f32.mrf.mxu0 }
 0x1bb   : > { %v1389_v24 = vpop.f32.mrf.mxu3  ;;  %v1563_v26 = vadd.f32 %v1517_v30, %v1406_v0  ;;  %v1548_v57 = vpop.f32.mrf.mxu1 }
 0x1bc   : > { %1616 = vst [vmem:[%s3066_s8 + $0x58] sm:$0xff] %v1600_v43  ;;  %v1407_v59 = vadd.f32 %v1389_v24, %v1250_v20 }
 0x1bd   : > { %v1585_v13 = vadd.f32 %v3056_v17, %v1563_v26 }
 0x1be   : > { %v1564_v25 = vadd.f32 %v1546_v50, %v1407_v59 }
 0x1bf   : > { %v1601_v46 = vmax.f32 %v1585_v13, 0.0 }
 0x1c0   : > { %v1586_v63 = vadd.f32 %v3058_v60, %v1564_v25  ;;  %v1362_v62 = vpop.f32.mrf.mxu2 }
 0x1c1   : > { %1617 = vst [vmem:[%s3066_s8 + $0x60] sm:$0xff] %v1601_v46  ;;  %v1408_v45 = vadd.f32 %v1362_v62, %v1251_v61 }
 0x1c2   : > { %v1602_v11 = vmax.f32 %v1586_v63, 0.0 }
 0x1c3   : > { %v1391_v44 = vpop.f32.mrf.mxu3  ;;  %v1565_v58 = vadd.f32 %v1519_v21, %v1408_v45 }
 0x1c4   : > { %1618 = vst [vmem:[%s3066_s8 + $0x68] sm:$0xff] %v1602_v11  ;;  %v1409_v18 = vadd.f32 %v1391_v44, %v1252_v55 }
 0x1c5   : > { %v1587_v16 = vadd.f32 %v3056_v17, %v1565_v58 }
 0x1c6   : > { %v1566_v15 = vadd.f32 %v1548_v57, %v1409_v18 }
 0x1c7   : > { %v1603_v19 = vmax.f32 %v1587_v16, 0.0 }
 0x1c8   : > { %v1588_v56 = vadd.f32 %v3058_v60, %v1566_v15 }
 0x1c9   : > { %1619 = vst [vmem:[%s3066_s8 + $0x70] sm:$0xff] %v1603_v19 }
 0x1ca   : > { %v1604_v35 = vmax.f32 %v1588_v56, 0.0 }
 0x1cc   : > { %1620 = vst [vmem:[%s3066_s8 + $0x78] sm:$0xff] %v1604_v35 }
 0x1cd   : > { %2372 = shalt.err (!%p2369_p5)
}
 0x1ce   : > { %s2425_s4 = smov 256   ;;  %s2426_s6 = smov 16  }
 0x1cf   : > { %2288 = dma.vmem_to_hbm [thread:$0]  (%p2487_p4), %s1638_s15, 2048, %s1640_s19, %s1622_s21, %s2425_s4, %s2425_s4, %s2426_s6  }
 0x1d0 PF: > { %p2294_p6 = scmp.ge.s32.totalorder %s2423_s17, 2  ;;  %s1654_s7 = sand.u32 1, %s2403_s12  }
 0x1d1   : > { %s1655_s8 = scalar_lea.sflag [#allocation3], %s1654_s7 }
 0x1d2   : > { %p2291_p7 = pnand %p2294_p6, %p2494_p8 }
 0x1d4   : > { %p2292_p9 = pneg %p2291_p7 }
 0x1d6   : > { %2398 = dma.done.wait (%p2292_p9), %s1655_s8, 2048  }
 0x1d7   : > { %2400 = vsyncadd (%p2292_p9), %s1655_s8, 4294965248  ;;  %s16_s17 = sadd.s32 1, %s2423_s17   ;;  %s3177_s12 = smov %s2407_s13 }
 0x1d8   : > { %p13_p10 = scmp.ge.s32.totalorder %s16_s17, 4   ;;  %s3178_s13 = smov %s2411_s14 }
 0x1d9   : > { %s3179_s14 = smov %s2500_s25  ;;  %s3180_s15 = smov %s2419_s16 }
 0x1da   : > { %s3181_s16 = smov %s3183_s20  ;;  %15 = sbr.rel (!%p13_p10) target bundleno = 4 (0x4), region = 84 }
 0x1df   :  { %1661 = vsyncpa [#allocation3], 1 }
 0x1e0   :  { %1663 = vsyncpa [#allocation3 + $0x1], 1 }

</bundles_post_ra>
